<compile_context>
chip_gen: v7x
topology: tpu7x:2x2x1
jax: 0.10.0
libtpu: 0.0.40
codegen_flags: <defaults>
</compile_context>

<pallas_src>
import math
from functools import partial

import jax
import jax.numpy as jnp
from jax.experimental import pallas as pl
from jax.experimental.pallas import tpu as pltpu

EPS = 1e-5                       # nn.BatchNorm1d default
_INV_SQRT2 = 1.0 / math.sqrt(2.0)
_LANE = 128
_SUB = 16                        # sublane granularity for time tiles (bf16-pack safe)
_TM_TARGET = 1024                # time-tile target; sweep 1024-2048 per generation


def _round_up(a: int, b: int) -> int:
    return (a + b - 1) // b * b


def _conv_tile(cur_ref, nxt_ref, w_ref, xbuf, *, tm, halo, k_size, cin, cin_p, cout_p):
    """Stage the real channels of a (tm [+ halo], Cin) time window into a 128-lane
    VMEM buffer and run K shifted bf16 matmuls accumulated in f32."""
    if cin == cin_p:
        xbuf[0:tm, :] = cur_ref[0].astype(jnp.float32)
        xbuf[tm:tm + halo, :] = nxt_ref[0].astype(jnp.float32)
    else:
        # Zero the whole buffer first so padded lanes never hold stale VMEM
        # (stale NaN * zero-weight would still poison the matmul).  ~30 vreg stores.
        xbuf[...] = jnp.zeros(xbuf.shape, xbuf.dtype)
        xbuf[0:tm, 0:cin] = cur_ref[0].astype(jnp.float32)
        xbuf[tm:tm + halo, 0:cin] = nxt_ref[0].astype(jnp.float32)
    y = jnp.zeros((tm, cout_p), jnp.float32)
    for k in range(k_size):        # K is tiny (e.g. 3): unrolled
        # xbuf is kept f32 so the sublane-shifted reads are plain (unpacked) row
        # relayouts; the bf16 cast right before the dot feeds the MXU its native
        # operand type.  (Per-tap cast is cheap VPU filler vs. the matmul.)
        lhs = xbuf[k:k + tm, :].astype(jnp.bfloat16)
        y = y + jnp.dot(lhs, w_ref[k], preferred_element_type=jnp.float32)
    return y


def _pass1_kernel(cur_ref, nxt_ref, w_ref, sum_ref, css_ref, xbuf, *,
                  tm, halo, k_size, cin, cin_p, cout_p, t_real, nt):
    y = _conv_tile(cur_ref, nxt_ref, w_ref, xbuf, tm=tm, halo=halo, k_size=k_size,
                   cin=cin, cin_p=cin_p, cout_p=cout_p)

    def _write(y_for_sum, inv_n, mask):
        s = jnp.sum(y_for_sum, axis=0, keepdims=True)          # (1, cout_p)
        mu = s * inv_n
        d = (y - mu) if mask is None else (y - mu) * mask
        css = jnp.sum(d * d, axis=0, keepdims=True)
        sum_ref[...] = s.reshape(1, 1, 1, cout_p)
        css_ref[...] = css.reshape(1, 1, 1, cout_p)

    if nt * tm == t_real:
        # No time padding anywhere: plain per-tile stats.
        _write(y, 1.0 / tm, None)
    else:
        # Only the last time tile contains padded rows: gate the masking so
        # interior tiles skip the iota/compare/multiply entirely.
        n_last = t_real - (nt - 1) * tm
        is_last = pl.program_id(1) == nt - 1

        @pl.when(jnp.logical_not(is_last))
        def _():
            _write(y, 1.0 / tm, None)

        @pl.when(is_last)
        def _():
            row = jax.lax.broadcasted_iota(jnp.int32, (tm, 1), 0)
            mask = (row < n_last).astype(jnp.float32)
            _write(y * mask, 1.0 / n_last, mask)


def _pass2_kernel(cur_ref, nxt_ref, w_ref, scale_ref, shift_ref, o_ref, xbuf, *,
                  tm, halo, k_size, cin, cin_p, cout, cout_p):
    y = _conv_tile(cur_ref, nxt_ref, w_ref, xbuf, tm=tm, halo=halo, k_size=k_size,
                   cin=cin, cin_p=cin_p, cout_p=cout_p)
    # BatchNorm folded into per-channel scale/shift (computed between passes).
    yb = y * scale_ref[...] + shift_ref[...]
    # Exact GELU (nn.GELU default approximate='none').
    # TODO(synk): tanh-approx GELU would move this onto the (otherwise idle) EUP.
    g = 0.5 * yb * (1.0 + jax.lax.erf(yb * _INV_SQRT2))
    # Write the output directly in NCW (time on lanes): no wrapper transpose and no
    # Cout padding ever reaches HBM.
    gt = jnp.transpose(g, (1, 0))                               # (cout_p, tm)
    o_ref[...] = gt[0:cout, :].reshape(1, cout, tm)


@jax.jit
def cbr_forward(x, state_buf, state_off, weight, gamma, beta):
    """x: (B, Cin, T) f32 NCW; state_buf: (B, Cin, K-1); weight: (Cout, Cin, K)."""
    B, Cin, T = x.shape
    Cout, _, K = weight.shape

    halo = _round_up(max(K - 1, 1), _SUB)
    tm_single = _round_up(max(T, _SUB), halo)
    if tm_single <= _TM_TARGET:
        tm = tm_single                                    # single tile covers all of T
    else:
        tm = _round_up(_TM_TARGET, math.lcm(_LANE, halo))
    assert tm % halo == 0 and halo >= K - 1               # nxt_spec index-map contract
    nt = -(-T // tm)
    t_pad = nt * tm
    cin_p = _round_up(Cin, _LANE)
    cout_p = _round_up(Cout, _LANE)

    # ---- layout glue (one fused XLA copy): NCW -> NWC bf16, prepend streaming state,
    # zero-pad time.  Channels are NOT padded in HBM; lanes are zero-extended on-chip.
    # TODO(synk): folding this transpose/concat into the kernel (read NCW blocks and
    # XLU-transpose in-kernel) would remove the last wrapper-side copy of x.
    x_nwc = jnp.transpose(x, (0, 2, 1)).astype(jnp.bfloat16)        # (B, T, Cin)
    st_nwc = jnp.transpose(state_buf, (0, 2, 1)).astype(jnp.bfloat16)
    xcat = jnp.concatenate([st_nwc, x_nwc], axis=1)                 # (B, T+K-1, Cin)
    xcat = jnp.pad(xcat, ((0, 0), (0, t_pad + halo - (T + K - 1)), (0, 0)))

    w3 = jnp.transpose(weight, (2, 1, 0))                           # (K, Cin, Cout)
    w3 = jnp.pad(w3, ((0, 0), (0, cin_p - Cin), (0, cout_p - Cout))).astype(jnp.bfloat16)
    gamma_p = jnp.pad(gamma.astype(jnp.float32), (0, cout_p - Cout))
    beta_p = jnp.pad(beta.astype(jnp.float32), (0, cout_p - Cout))

    cur_spec = pl.BlockSpec((1, tm, Cin), lambda b, t: (b, t, 0))
    nxt_spec = pl.BlockSpec((1, halo, Cin), lambda b, t: (b, (t + 1) * (tm // halo), 0))
    # Weights / per-channel vectors stay VMEM resident via constant index maps.
    w_spec = pl.BlockSpec((K, cin_p, cout_p), lambda b, t: (0, 0, 0))
    ch_spec = pl.BlockSpec((1, cout_p), lambda b, t: (0, 0))

    grid = (B, nt)
    flops = 2 * B * t_pad * K * cin_p * cout_p
    in_bytes = xcat.size * 2 + w3.size * 2
    scratch = [pltpu.VMEM((tm + halo, cin_p), jnp.float32)]
    cparams = pltpu.CompilerParams(
        dimension_semantics=("parallel", "parallel"),
        vmem_limit_bytes=48 * 1024 * 1024)

    # ---- pass 1: conv + per-tile (sum, centered sum-of-squares) BN partials ----
    stat_spec = pl.BlockSpec((1, 1, 1, cout_p), lambda b, t: (b, t, 0, 0))
    stat_shape = jax.ShapeDtypeStruct((B, nt, 1, cout_p), jnp.float32)
    sum_p, css_p = pl.pallas_call(
        partial(_pass1_kernel, tm=tm, halo=halo, k_size=K, cin=Cin, cin_p=cin_p,
                cout_p=cout_p, t_real=T, nt=nt),
        out_shape=(stat_shape, stat_shape),
        grid_spec=pltpu.PrefetchScalarGridSpec(
            num_scalar_prefetch=0, grid=grid,
            in_specs=[cur_spec, nxt_spec, w_spec],
            out_specs=(stat_spec, stat_spec),
            scratch_shapes=scratch),
        compiler_params=cparams,
        cost_estimate=pl.CostEstimate(
            flops=flops, transcendentals=0,
            bytes_accessed=in_bytes + 2 * B * nt * cout_p * 4),
    )(xcat, xcat, w3)

    # ---- fold BN batch stats into scale/shift (Chan's parallel-variance combine) ----
    n_t = jnp.minimum(tm, T - jnp.arange(nt) * tm).astype(jnp.float32)   # (nt,)
    cnt = jnp.float32(B * T)
    s_bt = sum_p[:, :, 0, :]                                             # (B, nt, cout_p)
    css_bt = css_p[:, :, 0, :]
    mean = jnp.sum(s_bt, axis=(0, 1)) / cnt                              # (cout_p,)
    mu_bt = s_bt / n_t[None, :, None]
    var = (jnp.sum(css_bt, axis=(0, 1)) +
           jnp.sum(n_t[None, :, None] * (mu_bt - mean) ** 2, axis=(0, 1))) / cnt
    var = jnp.maximum(var, 0.0)
    inv_std = jax.lax.rsqrt(var + EPS)
    scale = (gamma_p * inv_std).reshape(1, cout_p)
    shift = (beta_p - mean * gamma_p * inv_std).reshape(1, cout_p)

    # ---- pass 2: conv (recomputed) + scale/shift + exact GELU, NCW output blocks ----
    # TODO(synk): when compute bound (large Cin/Cout), cache pass-1's bf16 conv output
    # instead of recomputing the matmuls here.
    out_spec = pl.BlockSpec((1, Cout, tm), lambda b, t: (b, 0, t))
    out_pad = pl.pallas_call(
        partial(_pass2_kernel, tm=tm, halo=halo, k_size=K, cin=Cin, cin_p=cin_p,
                cout=Cout, cout_p=cout_p),
        out_shape=jax.ShapeDtypeStruct((B, Cout, t_pad), jnp.float32),
        grid_spec=pltpu.PrefetchScalarGridSpec(
            num_scalar_prefetch=0, grid=grid,
            in_specs=[cur_spec, nxt_spec, w_spec, ch_spec, ch_spec],
            out_specs=out_spec,
            scratch_shapes=scratch),
        compiler_params=cparams,
        cost_estimate=pl.CostEstimate(
            flops=flops, transcendentals=B * t_pad * cout_p,
            bytes_accessed=in_bytes + B * t_pad * Cout * 4),
    )(xcat, xcat, w3, scale, shift)

    out = out_pad[:, :, :T]                                   # already NCW

    # streaming state update: last K-1 input frames (kept in f32)
    if K > 1:
        if T >= K - 1:
            new_state_buf = x[:, :, T - (K - 1):]
        else:
            new_state_buf = jnp.concatenate([state_buf, x], axis=-1)[:, :, -(K - 1):]
    else:
        new_state_buf = state_buf
    new_state_off = state_off + T
    return out, (new_state_buf, new_state_off)


def reference_forward(x, state_buf, weight, gamma, beta):
    """Pure-JAX reference with matching numerics (bf16 conv operands, f32 accumulate)."""
    B, Cin, T = x.shape
    Cout, _, K = weight.shape
    xcat = jnp.concatenate([state_buf, x], axis=-1).astype(jnp.bfloat16)
    wb = weight.astype(jnp.bfloat16)
    y = jnp.zeros((B, Cout, T), jnp.float32)
    for k in range(K):
        y = y + jnp.einsum("oc,bct->bot", wb[:, :, k], xcat[:, :, k:k + T],
                           preferred_element_type=jnp.float32)
    mean = jnp.mean(y, axis=(0, 2), keepdims=True)
    var = jnp.mean((y - mean) ** 2, axis=(0, 2), keepdims=True)
    yn = (y - mean) * jax.lax.rsqrt(var + EPS)
    yb = yn * gamma.reshape(1, Cout, 1) + beta.reshape(1, Cout, 1)
    return 0.5 * yb * (1.0 + jax.lax.erf(yb * _INV_SQRT2))


if __name__ == "__main__":
    B, Cin, Cout, K, T = 2, 4, 8, 3, 16

    key = jax.random.PRNGKey(0)
    kx, kw = jax.random.split(key)
    x = jax.random.normal(kx, (B, Cin, T), dtype=jnp.float32)
    # Deterministic parameter init (synthetic; not loaded from a checkpoint).
    weight = jax.random.normal(kw, (Cout, Cin, K), dtype=jnp.float32) * 0.1
    gamma = jnp.ones((Cout,), jnp.float32)    # BatchNorm1d default init
    beta = jnp.zeros((Cout,), jnp.float32)

    # state=None path: zero-initialized streaming buffer, offset 0.
    state_buf = jnp.zeros((B, Cin, K - 1), jnp.float32)
    state_off = jnp.int32(0)

    out, (new_buf, new_off) = cbr_forward(x, state_buf, state_off,
                                          weight, gamma, beta)
    out = jax.block_until_ready(out)
    jax.block_until_ready(new_buf)

    ref = reference_forward(x, state_buf, weight, gamma, beta)
    assert out.shape == (B, Cout, T)
    assert new_buf.shape == (B, Cin, K - 1)
    err = float(jnp.max(jnp.abs(out - ref)))
    assert err < 1e-3, f"mismatch vs reference: {err}"

    print("KERNEL_OK")
</pallas_src>

<mosaic_0001>
module attributes {stable_mosaic.version = 11 : i64} {
  func.func @_pass1_kernel(%arg0: i32, %arg1: i32, %arg2: memref<1x16x4xbf16, #tpu.memory_space<vmem>>, %arg3: memref<1x16x4xbf16, #tpu.memory_space<vmem>>, %arg4: memref<3x128x128xbf16, #tpu.memory_space<vmem>>, %arg5: memref<1x1x1x128xf32, #tpu.memory_space<vmem>>, %arg6: memref<1x1x1x128xf32, #tpu.memory_space<vmem>>, %arg7: memref<32x128xf32, #tpu.memory_space<vmem>>) attributes {dimension_semantics = [#tpu.dimension_semantics<parallel>, #tpu.dimension_semantics<parallel>], iteration_bounds = array<i64: 2, 1>, scalar_prefetch = 0 : i64, scratch_operands = 1 : i64, tpu.core_type = #tpu.core_type<tc>, window_params = [{transform_indices = @transform_0, window_bounds = array<i64: 1, 16, 4>}, {transform_indices = @transform_1, window_bounds = array<i64: 1, 16, 4>}, {pipeline_mode = #tpu.pipeline_mode<synchronous>, transform_indices = @transform_2, window_bounds = array<i64: 3, 128, 128>}, {transform_indices = @transform_3, window_bounds = array<i64: 1, 1, 1, 128>}, {transform_indices = @transform_4, window_bounds = array<i64: 1, 1, 1, 128>}]} {
    %cst = arith.constant 0.000000e+00 : f32
    %0 = vector.broadcast %cst : f32 to vector<32x128xf32>
    %c0 = arith.constant 0 : index
    %c0_0 = arith.constant 0 : index
    %1 = vector.load %arg7[%c0, %c0_0] : memref<32x128xf32, #tpu.memory_space<vmem>>, vector<32x128xf32>
    tpu.vector_store %arg7[%c0, %c0_0], %0 {strides = array<i32>} : memref<32x128xf32, #tpu.memory_space<vmem>>, vector<32x128xf32>,
    %c0_1 = arith.constant 0 : index
    %c0_2 = arith.constant 0 : index
    %c0_3 = arith.constant 0 : index
    %2 = vector.load %arg2[%c0_1, %c0_2, %c0_3] : memref<1x16x4xbf16, #tpu.memory_space<vmem>>, vector<1x16x4xbf16>
    %3 = vector.shape_cast %2 : vector<1x16x4xbf16> to vector<16x4xbf16>
    %4 = arith.extf %3 : vector<16x4xbf16> to vector<16x4xf32>
    %c0_4 = arith.constant 0 : index
    %c0_5 = arith.constant 0 : index
    %5 = vector.load %arg7[%c0_4, %c0_5] : memref<32x128xf32, #tpu.memory_space<vmem>>, vector<16x4xf32>
    tpu.vector_store %arg7[%c0_4, %c0_5], %4 {strides = array<i32>} : memref<32x128xf32, #tpu.memory_space<vmem>>, vector<16x4xf32>,
    %c0_6 = arith.constant 0 : index
    %c0_7 = arith.constant 0 : index
    %c0_8 = arith.constant 0 : index
    %6 = vector.load %arg3[%c0_6, %c0_7, %c0_8] : memref<1x16x4xbf16, #tpu.memory_space<vmem>>, vector<1x16x4xbf16>
    %7 = vector.shape_cast %6 : vector<1x16x4xbf16> to vector<16x4xbf16>
    %8 = arith.extf %7 : vector<16x4xbf16> to vector<16x4xf32>
    %c16 = arith.constant 16 : index
    %c0_9 = arith.constant 0 : index
    %9 = vector.load %arg7[%c16, %c0_9] : memref<32x128xf32, #tpu.memory_space<vmem>>, vector<16x4xf32>
    tpu.vector_store %arg7[%c16, %c0_9], %8 {strides = array<i32>} : memref<32x128xf32, #tpu.memory_space<vmem>>, vector<16x4xf32>,
    %cst_10 = arith.constant 0.000000e+00 : f32
    %10 = vector.broadcast %cst_10 : f32 to vector<16x128xf32>
    %c0_11 = arith.constant 0 : index
    %c0_12 = arith.constant 0 : index
    %11 = vector.load %arg7[%c0_11, %c0_12] : memref<32x128xf32, #tpu.memory_space<vmem>>, vector<16x128xf32>
    %12 = arith.truncf %11 : vector<16x128xf32> to vector<16x128xbf16>
    %c0_13 = arith.constant 0 : index
    %c0_14 = arith.constant 0 : index
    %c0_15 = arith.constant 0 : index
    %13 = vector.load %arg4[%c0_13, %c0_14, %c0_15] : memref<3x128x128xbf16, #tpu.memory_space<vmem>>, vector<1x128x128xbf16>
    %14 = vector.shape_cast %13 : vector<1x128x128xbf16> to vector<128x128xbf16>
    %cst_16 = arith.constant dense<0.000000e+00> : vector<16x128xf32>
    %15 = tpu.matmul %12, %14, %cst_16 {dimension_numbers = #tpu.dot_dimension_numbers<[1], [0], [0], [1], [0, 0, 1, 1], [], []>} : vector<16x128xbf16>, vector<128x128xbf16>, vector<16x128xf32> -> vector<16x128xf32>
    %16 = arith.addf %10, %15 : vector<16x128xf32>
    %c1 = arith.constant 1 : index
    %c0_17 = arith.constant 0 : index
    %17 = vector.load %arg7[%c1, %c0_17] : memref<32x128xf32, #tpu.memory_space<vmem>>, vector<16x128xf32>
    %18 = arith.truncf %17 : vector<16x128xf32> to vector<16x128xbf16>
    %c1_18 = arith.constant 1 : index
    %c0_19 = arith.constant 0 : index
    %c0_20 = arith.constant 0 : index
    %19 = vector.load %arg4[%c1_18, %c0_19, %c0_20] : memref<3x128x128xbf16, #tpu.memory_space<vmem>>, vector<1x128x128xbf16>
    %20 = vector.shape_cast %19 : vector<1x128x128xbf16> to vector<128x128xbf16>
    %cst_21 = arith.constant dense<0.000000e+00> : vector<16x128xf32>
    %21 = tpu.matmul %18, %20, %cst_21 {dimension_numbers = #tpu.dot_dimension_numbers<[1], [0], [0], [1], [0, 0, 1, 1], [], []>} : vector<16x128xbf16>, vector<128x128xbf16>, vector<16x128xf32> -> vector<16x128xf32>
    %22 = arith.addf %16, %21 : vector<16x128xf32>
    %c2 = arith.constant 2 : index
    %c0_22 = arith.constant 0 : index
    %23 = vector.load %arg7[%c2, %c0_22] : memref<32x128xf32, #tpu.memory_space<vmem>>, vector<16x128xf32>
    %24 = arith.truncf %23 : vector<16x128xf32> to vector<16x128xbf16>
    %c2_23 = arith.constant 2 : index
    %c0_24 = arith.constant 0 : index
    %c0_25 = arith.constant 0 : index
    %25 = vector.load %arg4[%c2_23, %c0_24, %c0_25] : memref<3x128x128xbf16, #tpu.memory_space<vmem>>, vector<1x128x128xbf16>
    %26 = vector.shape_cast %25 : vector<1x128x128xbf16> to vector<128x128xbf16>
    %cst_26 = arith.constant dense<0.000000e+00> : vector<16x128xf32>
    %27 = tpu.matmul %24, %26, %cst_26 {dimension_numbers = #tpu.dot_dimension_numbers<[1], [0], [0], [1], [0, 0, 1, 1], [], []>} : vector<16x128xbf16>, vector<128x128xbf16>, vector<16x128xf32> -> vector<16x128xf32>
    %28 = arith.addf %22, %27 : vector<16x128xf32>
    %cst_27 = arith.constant dense<0.000000e+00> : vector<128xf32>
    %29 = vector.multi_reduction <add>, %28, %cst_27 [0] : vector<16x128xf32> to vector<128xf32>
    %30 = vector.shape_cast %29 : vector<128xf32> to vector<1x128xf32>
    %cst_28 = arith.constant 6.250000e-02 : f32
    %31 = vector.broadcast %cst_28 : f32 to vector<1x128xf32>
    %32 = arith.mulf %30, %31 : vector<1x128xf32>
    %33 = vector.broadcast %32 : vector<1x128xf32> to vector<16x128xf32>
    %34 = arith.subf %28, %33 : vector<16x128xf32>
    %35 = arith.mulf %34, %34 : vector<16x128xf32>
    %cst_29 = arith.constant dense<0.000000e+00> : vector<128xf32>
    %36 = vector.multi_reduction <add>, %35, %cst_29 [0] : vector<16x128xf32> to vector<128xf32>
    %37 = vector.shape_cast %36 : vector<128xf32> to vector<1x128xf32>
    %38 = vector.shape_cast %30 : vector<1x128xf32> to vector<1x1x1x128xf32>
    %c0_30 = arith.constant 0 : index
    %c0_31 = arith.constant 0 : index
    %c0_32 = arith.constant 0 : index
    %c0_33 = arith.constant 0 : index
    %39 = vector.load %arg5[%c0_30, %c0_31, %c0_32, %c0_33] : memref<1x1x1x128xf32, #tpu.memory_space<vmem>>, vector<1x1x1x128xf32>
    tpu.vector_store %arg5[%c0_30, %c0_31, %c0_32, %c0_33], %38 {strides = array<i32>} : memref<1x1x1x128xf32, #tpu.memory_space<vmem>>, vector<1x1x1x128xf32>,
    %40 = vector.shape_cast %37 : vector<1x128xf32> to vector<1x1x1x128xf32>
    %c0_34 = arith.constant 0 : index
    %c0_35 = arith.constant 0 : index
    %c0_36 = arith.constant 0 : index
    %c0_37 = arith.constant 0 : index
    %41 = vector.load %arg6[%c0_34, %c0_35, %c0_36, %c0_37] : memref<1x1x1x128xf32, #tpu.memory_space<vmem>>, vector<1x1x1x128xf32>
    tpu.vector_store %arg6[%c0_34, %c0_35, %c0_36, %c0_37], %40 {strides = array<i32>} : memref<1x1x1x128xf32, #tpu.memory_space<vmem>>, vector<1x1x1x128xf32>,
    return
  }
  func.func @transform_0(%arg0: i32, %arg1: i32) -> (i32, i32, i32) {
    %c0_i32 = arith.constant 0 : i32
    %c0_i32_0 = arith.constant 0 : i32
    return %arg0, %arg1, %c0_i32 : i32, i32, i32
  }
  func.func @transform_1(%arg0: i32, %arg1: i32) -> (i32, i32, i32) {
    %c1_i32 = arith.constant 1 : i32
    %0 = arith.addi %arg1, %c1_i32 : i32
    %c1_i32_0 = arith.constant 1 : i32
    %1 = arith.muli %0, %c1_i32_0 : i32
    %c0_i32 = arith.constant 0 : i32
    %c0_i32_1 = arith.constant 0 : i32
    return %arg0, %1, %c0_i32 : i32, i32, i32
  }
  func.func @transform_2(%arg0: i32, %arg1: i32) -> (i32, i32, i32) {
    %c0_i32 = arith.constant 0 : i32
    %c0_i32_0 = arith.constant 0 : i32
    %c0_i32_1 = arith.constant 0 : i32
    %c0_i32_2 = arith.constant 0 : i32
    return %c0_i32, %c0_i32_0, %c0_i32_1 : i32, i32, i32
  }
  func.func @transform_3(%arg0: i32, %arg1: i32) -> (i32, i32, i32, i32) {
    %c0_i32 = arith.constant 0 : i32
    %c0_i32_0 = arith.constant 0 : i32
    %c0_i32_1 = arith.constant 0 : i32
    return %arg0, %arg1, %c0_i32, %c0_i32_0 : i32, i32, i32, i32
  }
  func.func @transform_4(%arg0: i32, %arg1: i32) -> (i32, i32, i32, i32) {
    %c0_i32 = arith.constant 0 : i32
    %c0_i32_0 = arith.constant 0 : i32
    %c0_i32_1 = arith.constant 0 : i32
    return %arg0, %arg1, %c0_i32, %c0_i32_0 : i32, i32, i32, i32
  }
}

module attributes {stable_mosaic.version = 11 : i64} {
  func.func @_pass2_kernel(%arg0: i32, %arg1: i32, %arg2: memref<1x16x4xbf16, #tpu.memory_space<vmem>>, %arg3: memref<1x16x4xbf16, #tpu.memory_space<vmem>>, %arg4: memref<3x128x128xbf16, #tpu.memory_space<vmem>>, %arg5: memref<1x128xf32, #tpu.memory_space<vmem>>, %arg6: memref<1x128xf32, #tpu.memory_space<vmem>>, %arg7: memref<1x8x16xf32, #tpu.memory_space<vmem>>, %arg8: memref<32x128xf32, #tpu.memory_space<vmem>>) attributes {dimension_semantics = [#tpu.dimension_semantics<parallel>, #tpu.dimension_semantics<parallel>], iteration_bounds = array<i64: 2, 1>, scalar_prefetch = 0 : i64, scratch_operands = 1 : i64, tpu.core_type = #tpu.core_type<tc>, window_params = [{transform_indices = @transform_0, window_bounds = array<i64: 1, 16, 4>}, {transform_indices = @transform_1, window_bounds = array<i64: 1, 16, 4>}, {pipeline_mode = #tpu.pipeline_mode<synchronous>, transform_indices = @transform_2, window_bounds = array<i64: 3, 128, 128>}, {pipeline_mode = #tpu.pipeline_mode<synchronous>, transform_indices = @transform_3, window_bounds = array<i64: 1, 128>}, {pipeline_mode = #tpu.pipeline_mode<synchronous>, transform_indices = @transform_4, window_bounds = array<i64: 1, 128>}, {transform_indices = @transform_5, window_bounds = array<i64: 1, 8, 16>}]} {
    %cst = arith.constant 0.000000e+00 : f32
    %0 = vector.broadcast %cst : f32 to vector<32x128xf32>
    %c0 = arith.constant 0 : index
    %c0_0 = arith.constant 0 : index
    %1 = vector.load %arg8[%c0, %c0_0] : memref<32x128xf32, #tpu.memory_space<vmem>>, vector<32x128xf32>
    tpu.vector_store %arg8[%c0, %c0_0], %0 {strides = array<i32>} : memref<32x128xf32, #tpu.memory_space<vmem>>, vector<32x128xf32>,
    %c0_1 = arith.constant 0 : index
    %c0_2 = arith.constant 0 : index
    %c0_3 = arith.constant 0 : index
    %2 = vector.load %arg2[%c0_1, %c0_2, %c0_3] : memref<1x16x4xbf16, #tpu.memory_space<vmem>>, vector<1x16x4xbf16>
    %3 = vector.shape_cast %2 : vector<1x16x4xbf16> to vector<16x4xbf16>
    %4 = arith.extf %3 : vector<16x4xbf16> to vector<16x4xf32>
    %c0_4 = arith.constant 0 : index
    %c0_5 = arith.constant 0 : index
    %5 = vector.load %arg8[%c0_4, %c0_5] : memref<32x128xf32, #tpu.memory_space<vmem>>, vector<16x4xf32>
    tpu.vector_store %arg8[%c0_4, %c0_5], %4 {strides = array<i32>} : memref<32x128xf32, #tpu.memory_space<vmem>>, vector<16x4xf32>,
    %c0_6 = arith.constant 0 : index
    %c0_7 = arith.constant 0 : index
    %c0_8 = arith.constant 0 : index
    %6 = vector.load %arg3[%c0_6, %c0_7, %c0_8] : memref<1x16x4xbf16, #tpu.memory_space<vmem>>, vector<1x16x4xbf16>
    %7 = vector.shape_cast %6 : vector<1x16x4xbf16> to vector<16x4xbf16>
    %8 = arith.extf %7 : vector<16x4xbf16> to vector<16x4xf32>
    %c16 = arith.constant 16 : index
    %c0_9 = arith.constant 0 : index
    %9 = vector.load %arg8[%c16, %c0_9] : memref<32x128xf32, #tpu.memory_space<vmem>>, vector<16x4xf32>
    tpu.vector_store %arg8[%c16, %c0_9], %8 {strides = array<i32>} : memref<32x128xf32, #tpu.memory_space<vmem>>, vector<16x4xf32>,
    %cst_10 = arith.constant 0.000000e+00 : f32
    %10 = vector.broadcast %cst_10 : f32 to vector<16x128xf32>
    %c0_11 = arith.constant 0 : index
    %c0_12 = arith.constant 0 : index
    %11 = vector.load %arg8[%c0_11, %c0_12] : memref<32x128xf32, #tpu.memory_space<vmem>>, vector<16x128xf32>
    %12 = arith.truncf %11 : vector<16x128xf32> to vector<16x128xbf16>
    %c0_13 = arith.constant 0 : index
    %c0_14 = arith.constant 0 : index
    %c0_15 = arith.constant 0 : index
    %13 = vector.load %arg4[%c0_13, %c0_14, %c0_15] : memref<3x128x128xbf16, #tpu.memory_space<vmem>>, vector<1x128x128xbf16>
    %14 = vector.shape_cast %13 : vector<1x128x128xbf16> to vector<128x128xbf16>
    %cst_16 = arith.constant dense<0.000000e+00> : vector<16x128xf32>
    %15 = tpu.matmul %12, %14, %cst_16 {dimension_numbers = #tpu.dot_dimension_numbers<[1], [0], [0], [1], [0, 0, 1, 1], [], []>} : vector<16x128xbf16>, vector<128x128xbf16>, vector<16x128xf32> -> vector<16x128xf32>
    %16 = arith.addf %10, %15 : vector<16x128xf32>
    %c1 = arith.constant 1 : index
    %c0_17 = arith.constant 0 : index
    %17 = vector.load %arg8[%c1, %c0_17] : memref<32x128xf32, #tpu.memory_space<vmem>>, vector<16x128xf32>
    %18 = arith.truncf %17 : vector<16x128xf32> to vector<16x128xbf16>
    %c1_18 = arith.constant 1 : index
    %c0_19 = arith.constant 0 : index
    %c0_20 = arith.constant 0 : index
    %19 = vector.load %arg4[%c1_18, %c0_19, %c0_20] : memref<3x128x128xbf16, #tpu.memory_space<vmem>>, vector<1x128x128xbf16>
    %20 = vector.shape_cast %19 : vector<1x128x128xbf16> to vector<128x128xbf16>
    %cst_21 = arith.constant dense<0.000000e+00> : vector<16x128xf32>
    %21 = tpu.matmul %18, %20, %cst_21 {dimension_numbers = #tpu.dot_dimension_numbers<[1], [0], [0], [1], [0, 0, 1, 1], [], []>} : vector<16x128xbf16>, vector<128x128xbf16>, vector<16x128xf32> -> vector<16x128xf32>
    %22 = arith.addf %16, %21 : vector<16x128xf32>
    %c2 = arith.constant 2 : index
    %c0_22 = arith.constant 0 : index
    %23 = vector.load %arg8[%c2, %c0_22] : memref<32x128xf32, #tpu.memory_space<vmem>>, vector<16x128xf32>
    %24 = arith.truncf %23 : vector<16x128xf32> to vector<16x128xbf16>
    %c2_23 = arith.constant 2 : index
    %c0_24 = arith.constant 0 : index
    %c0_25 = arith.constant 0 : index
    %25 = vector.load %arg4[%c2_23, %c0_24, %c0_25] : memref<3x128x128xbf16, #tpu.memory_space<vmem>>, vector<1x128x128xbf16>
    %26 = vector.shape_cast %25 : vector<1x128x128xbf16> to vector<128x128xbf16>
    %cst_26 = arith.constant dense<0.000000e+00> : vector<16x128xf32>
    %27 = tpu.matmul %24, %26, %cst_26 {dimension_numbers = #tpu.dot_dimension_numbers<[1], [0], [0], [1], [0, 0, 1, 1], [], []>} : vector<16x128xbf16>, vector<128x128xbf16>, vector<16x128xf32> -> vector<16x128xf32>
    %28 = arith.addf %22, %27 : vector<16x128xf32>
    %c0_27 = arith.constant 0 : index
    %c0_28 = arith.constant 0 : index
    %29 = vector.load %arg5[%c0_27, %c0_28] : memref<1x128xf32, #tpu.memory_space<vmem>>, vector<1x128xf32>
    %30 = vector.broadcast %29 : vector<1x128xf32> to vector<16x128xf32>
    %31 = arith.mulf %28, %30 : vector<16x128xf32>
    %c0_29 = arith.constant 0 : index
    %c0_30 = arith.constant 0 : index
    %32 = vector.load %arg6[%c0_29, %c0_30] : memref<1x128xf32, #tpu.memory_space<vmem>>, vector<1x128xf32>
    %33 = vector.broadcast %32 : vector<1x128xf32> to vector<16x128xf32>
    %34 = arith.addf %31, %33 : vector<16x128xf32>
    %cst_31 = arith.constant 5.000000e-01 : f32
    %35 = vector.broadcast %cst_31 : f32 to vector<16x128xf32>
    %36 = arith.mulf %35, %34 : vector<16x128xf32>
    %cst_32 = arith.constant 0.707106769 : f32
    %37 = vector.broadcast %cst_32 : f32 to vector<16x128xf32>
    %38 = arith.mulf %34, %37 : vector<16x128xf32>
    %39 = math.erf %38 : vector<16x128xf32>
    %cst_33 = arith.constant 1.000000e+00 : f32
    %40 = vector.broadcast %cst_33 : f32 to vector<16x128xf32>
    %41 = arith.addf %40, %39 : vector<16x128xf32>
    %42 = arith.mulf %36, %41 : vector<16x128xf32>
    %43 = tpu.transpose %42, [1, 0] : vector<16x128xf32> -> vector<128x16xf32>
    %44 = vector.extract_strided_slice %43 {offsets = [0, 0], sizes = [8, 16], strides = [1, 1]} : vector<128x16xf32> to vector<8x16xf32>
    %45 = vector.shape_cast %44 : vector<8x16xf32> to vector<1x8x16xf32>
    %c0_34 = arith.constant 0 : index
    %c0_35 = arith.constant 0 : index
    %c0_36 = arith.constant 0 : index
    %46 = vector.load %arg7[%c0_34, %c0_35, %c0_36] : memref<1x8x16xf32, #tpu.memory_space<vmem>>, vector<1x8x16xf32>
    tpu.vector_store %arg7[%c0_34, %c0_35, %c0_36], %45 {strides = array<i32>} : memref<1x8x16xf32, #tpu.memory_space<vmem>>, vector<1x8x16xf32>,
    return
  }
  func.func @transform_0(%arg0: i32, %arg1: i32) -> (i32, i32, i32) {
    %c0_i32 = arith.constant 0 : i32
    %c0_i32_0 = arith.constant 0 : i32
    return %arg0, %arg1, %c0_i32 : i32, i32, i32
  }
  func.func @transform_1(%arg0: i32, %arg1: i32) -> (i32, i32, i32) {
    %c1_i32 = arith.constant 1 : i32
    %0 = arith.addi %arg1, %c1_i32 : i32
    %c1_i32_0 = arith.constant 1 : i32
    %1 = arith.muli %0, %c1_i32_0 : i32
    %c0_i32 = arith.constant 0 : i32
    %c0_i32_1 = arith.constant 0 : i32
    return %arg0, %1, %c0_i32 : i32, i32, i32
  }
  func.func @transform_2(%arg0: i32, %arg1: i32) -> (i32, i32, i32) {
    %c0_i32 = arith.constant 0 : i32
    %c0_i32_0 = arith.constant 0 : i32
    %c0_i32_1 = arith.constant 0 : i32
    %c0_i32_2 = arith.constant 0 : i32
    return %c0_i32, %c0_i32_0, %c0_i32_1 : i32, i32, i32
  }
  func.func @transform_3(%arg0: i32, %arg1: i32) -> (i32, i32) {
    %c0_i32 = arith.constant 0 : i32
    %c0_i32_0 = arith.constant 0 : i32
    %c0_i32_1 = arith.constant 0 : i32
    return %c0_i32, %c0_i32_0 : i32, i32
  }
  func.func @transform_4(%arg0: i32, %arg1: i32) -> (i32, i32) {
    %c0_i32 = arith.constant 0 : i32
    %c0_i32_0 = arith.constant 0 : i32
    %c0_i32_1 = arith.constant 0 : i32
    return %c0_i32, %c0_i32_0 : i32, i32
  }
  func.func @transform_5(%arg0: i32, %arg1: i32) -> (i32, i32, i32) {
    %c0_i32 = arith.constant 0 : i32
    %c0_i32_0 = arith.constant 0 : i32
    return %arg0, %c0_i32, %arg1 : i32, i32, i32
  }
}

</mosaic_0001>

<bundles_post_ra>
// kernel: cbr_forward.3
= control target key start
LH: loop header
LB: loop body
LE: loop exit
PB: predicated region body
PF: predicated region fallthrough
CT: control target
= control target key end

     0   :  { %10 = vsyncpa [#allocation4], 0  ;;  %s1418_s0 = inlined_call_operand.vmem [shape: bf16[2,32,4], index: 0, kind: input, shape index: {}, may-alias: {0,1}]   ;;  %s1419_s1 = inlined_call_operand.vmem [shape: bf16[2,32,4], index: 1, kind: input, shape index: {}, may-alias: {0,1}]   ;;  %s1420_s2 = inlined_call_operand.vmem [shape: bf16[3,128,128], index: 2, kind: input, shape index: {}]   ;;  %s1421_s3 = inlined_call_operand.vmem [shape: f32[1,128], index: 3, kind: input, shape index: {}]   ;;  %s1422_s4 = inlined_call_operand.vmem [shape: f32[1,128], index: 4, kind: input, shape index: {}]   ;;  %s1423_s5 = inlined_call_operand.hbm [shape: f32[2,8,16], index: 5, kind: output, shape index: {}]  }
   0x1   :  { %12 = vsyncpa [#allocation4 + $0x1], 0  ;;  %s1186_s18 = smov 0   ;;  %s1188_s19 = smov 0  }
   0x2   :  { %s1190_s20 = smov 0   ;;  %s1192_s21 = smov 0  }
   0x3   :  { %s1194_s22 = smov 0   ;;  %s1196_s23 = smov 0  }
   0x4 LB: > { %s811_s24 = sadd.s32 4294967295, %s1151_s23   ;;  %s812_s25 = sadd.s32 4294967294, %s1151_s23   ;;  %s1151_s23 = sphi %s1196_s23, %s18_s23   ;;  %s1147_s22 = sphi %s1194_s22, %s1430_s22   ;;  %s1143_s21 = sphi %s1192_s21, %s1429_s21   ;;  %s1139_s20 = sphi %s1190_s20, %s1428_s20   ;;  %s1135_s19 = sphi %s1188_s19, %s1427_s19   ;;  %s1131_s18 = sphi %s1186_s18, %s1426_s18  }
   0x5   : > { %s30_s26 = sadd.s32 1, %s1147_s22  ;;  %s160_s27 = sadd.s32 1, %s1139_s20 }
   0x6   : > { %p32_p0 = scmp.ge.s32.totalorder %s30_s26, 2  ;;  %p170_p1 = scmp.ne.s32.totalorder %s1139_s20, %s1135_s19 }
   0x7   : > { %p171_p2 = scmp.eq.s32.totalorder %s811_s24, 1  ;;  %p176_p3 = scmp.ne.s32.totalorder %s1135_s19, %s1131_s18 }
   0x8   : > { %s1432_s26 = smov (%p32_p0, %s30_s26), 0  ;;  %p177_p5 = scmp.eq.s32.totalorder %s812_s25, 1 }
   0x9   : > { %p1226_p4 = por %p171_p2, %p170_p1  ;;  %s155_s29 = ssub.s32 %s1147_s22, %s1432_s26 }
   0xa   : > { %p815_p6 = scmp.ge.s32.totalorder %s1151_s23, 1  ;;  %p158_p7 = scmp.eq.s32.totalorder %s155_s29, 0 }
   0xb   : > { %p1233_p8 = por %p177_p5, %p176_p3  ;;  %p232_p9 = scmp.lt.s32.totalorder %s1151_s23, 3 }
   0xc   : > { %s1239_s6 = scalar_select %p158_p7, %s1139_s20, %s160_s27  }
   0xd   : > { %p233_p10 = pnand %p815_p6, %p232_p9 }
   0xe   : > { %v1045_v0 = vld [vmem:[%s1420_s2] sm:$0xff] (!%p233_p10)   ;;  %v1153_v1 = vmov (!%p233_p10), 0.0   ;;  %v1046_v2 = vld [vmem:[%s1420_s2 + $0x8] sm:$0xff] (!%p233_p10)   ;;  %vm1154_vm0 = vmmov (!%p233_p10), 0   ;;  %p275_p11 = scmp.lt.s32.totalorder (!%p233_p10), %s1143_s21, 1  ;;  %v1047_v3 = vld [vmem:[%s1420_s2 + $0x10] sm:$0xff] (!%p233_p10)  }
   0xf   : > { %236 = sbr.rel (%p233_p10) target bundleno = 457 (0x1c9), region = 40  ;;  %942 = vmatprep.subr.bf16.mxu0 (!%p233_p10), %v1153_v1  ;;  %297 = vst [vmem:[#allocation2] sm:$0xff] (!%p233_p10), %v1153_v1  ;;  %298 = vst [vmem:[#allocation2 + $0x8] sm:$0xff] (!%p233_p10), %v1153_v1  ;;  %922 = vmatprep.subr.bf16.mxu1 (!%p233_p10), %v1153_v1  ;;  %v1053_v4 = vld [vmem:[%s1420_s2 + $0x40] sm:$0xff] (!%p233_p10)   ;;  %vm305_vm1 = vcmask (!%p233_p10), 31744   ;;  %v1048_v6 = vld [vmem:[%s1420_s2 + $0x18] sm:$0xff] (!%p233_p10)  }
  0x10   : > { %299 = vst [vmem:[#allocation2 + $0x10] sm:$0xff] (!%p233_p10), %v1153_v1  ;;  %943 = vmatpush3.bf16.msra.mxu0 (!%p233_p10), %v1045_v0  ;;  %958 = vmatprep.mubr.msk.bf16.mxu0 (!%p233_p10), %vm1154_vm0, %v1153_v1  ;;  %v1055_v9 = vld [vmem:[%s1420_s2 + $0x48] sm:$0xff] (!%p233_p10)   ;;  %v1049_v10 = vld [vmem:[%s1420_s2 + $0x20] sm:$0xff] (!%p233_p10)   ;;  %v1057_v11 = vld [vmem:[%s1420_s2 + $0x50] sm:$0xff] (!%p233_p10)   ;;  %s271_s9 = sand.u32 (!%p233_p10), 1, %s1135_s19   ;;  %vm702_vm2 = vcmask (!%p233_p10), 130048  }
  0x11   : > { %944 = vmatprep.subr.bf16.mxu0 (!%p233_p10), %v1153_v1  ;;  %938 = vmatprep.mubr.msk.bf16.mxu1 (!%p233_p10), %vm1154_vm0, %v1153_v1  ;;  %v1050_v12 = vld [vmem:[%s1420_s2 + $0x28] sm:$0xff] (!%p233_p10)   ;;  %v1059_v13 = vld [vmem:[%s1420_s2 + $0x58] sm:$0xff] (!%p233_p10)   ;;  %v1051_v14 = vld [vmem:[%s1420_s2 + $0x30] sm:$0xff] (!%p233_p10)   ;;  %s816_s10 = sshll.u32 (!%p233_p10), %s271_s9, 3 }
  0x12   : > { %923 = vmatpush3.bf16.msra.mxu1 (!%p233_p10), %v1053_v4  ;;  %v1061_v15 = vld [vmem:[%s1420_s2 + $0x60] sm:$0xff] (!%p233_p10)   ;;  %v1052_v17 = vld [vmem:[%s1420_s2 + $0x38] sm:$0xff] (!%p233_p10)   ;;  %v1063_v21 = vld [vmem:[%s1420_s2 + $0x68] sm:$0xff] (!%p233_p10)  }
  0x13   : > { %924 = vmatprep.subr.bf16.mxu1 (!%p233_p10), %v1153_v1  ;;  %v1054_v23 = vld [vmem:[%s1420_s2 + $0x80] sm:$0xff] (!%p233_p10)   ;;  %v1065_v24 = vld [vmem:[%s1420_s2 + $0x70] sm:$0xff] (!%p233_p10)   ;;  %v1056_v25 = vld [vmem:[%s1420_s2 + $0x88] sm:$0xff] (!%p233_p10)  }
  0x14   : > { %945 = vmatpush3.bf16.msra.mxu0 (!%p233_p10), %v1046_v2  ;;  %v1067_v26 = vld [vmem:[%s1420_s2 + $0x78] sm:$0xff] (!%p233_p10)   ;;  %v1058_v30 = vld [vmem:[%s1420_s2 + $0x90] sm:$0xff] (!%p233_p10)   ;;  %v1062_v32 = vld [vmem:[%s1420_s2 + $0xa0] sm:$0xff] (!%p233_p10)  }
  0x15   : > { %946 = vmatprep.subr.bf16.mxu0 (!%p233_p10), %v1153_v1  ;;  %v1060_v31 = vld [vmem:[%s1420_s2 + $0x98] sm:$0xff] (!%p233_p10)   ;;  %v1064_v33 = vld [vmem:[%s1420_s2 + $0xa8] sm:$0xff] (!%p233_p10)   ;;  %v1066_v34 = vld [vmem:[%s1420_s2 + $0xb0] sm:$0xff] (!%p233_p10)  }
  0x16   : > { %s1259_s11 = scalar_select %p275_p11, %s1143_s21, 1  ;;  %925 = vmatpush3.bf16.msra.mxu1 %v1055_v9  ;;  %v1068_v35 = vld [vmem:[%s1420_s2 + $0xb8] sm:$0xff]   ;;  %v877_v44 = vld [vmem:[%s1421_s3] ss:$0 sm:$0xff] }
  0x17   : > { %926 = vmatprep.subr.bf16.mxu1 %v1153_v1  ;;  %v878_v48 = vld [vmem:[%s1422_s4] ss:$0 sm:$0xff] }
  0x18   : > { %s883_s14 = sshll.u32 %s1259_s11, 4  ;;  %947 = vmatpush3.bf16.msra.mxu0 %v1047_v3  ;;  %s273_s11 = scalar_lea.vmem [#allocation3], %s816_s10 }
  0x19   : > { %s282_s17 = scalar_lea.vmem %s1418_s0, %s883_s14  ;;  %948 = vmatprep.subr.bf16.mxu0 %v1153_v1  ;;  %s885_s24 = sadd.s32 8, %s883_s14 }
  0x1a   : > { %v887_v5 = vld [vmem:[%s282_s17] sm:$0xff]   ;;  %927 = vmatpush3.bf16.msra.mxu1 %v1057_v11  ;;  %s293_s8 = scalar_lea.vmem %s1419_s1, %s885_s24  ;;  %s880_s14 = sshll.u32 %s1143_s21, 7 }
  0x1b   : > { %v888_v7 = vunpack.c.l.bf16 %v887_v5  ;;  %v889_v8 = vunpack.c.h.bf16 %v887_v5  ;;  %928 = vmatprep.subr.bf16.mxu1 %v1153_v1  ;;  %v891_v16 = vld [vmem:[%s293_s8] sm:$0xff]   ;;  %s719_s12 = sshll.u32 %s273_s11, 4  ;;  %s1371_s16 = scalar_lea.hbm %s1423_s5, %s880_s14  ;;  %s1373_s12 = int_to_ptr.vmem [resolvable:$true] %s719_s12 }
  0x1c   : > { %949 = vmatpush3.bf16.msra.mxu0 %v1048_v6  ;;  %v892_v18 = vunpack.c.l.bf16 %v891_v16  ;;  %s705_s17 = scalar_lea.sflag [#allocation4], %s271_s9  ;;  %s1073_s24 = scalar_lea.vmem %s1373_s12, 128 }
  0x1d   : > { %306 = vst.msk [vmem:[#allocation2] sm:$0xff] %vm305_vm1, %v888_v7  ;;  %307 = vst.msk [vmem:[#allocation2 + $0x8] sm:$0xff] %vm305_vm1, %v889_v8  ;;  %950 = vmatprep.subr.bf16.mxu0 %v1153_v1  ;;  %p1074_p12 = scmp.ne.s32.totalorder %s1373_s12, %s1073_s24  ;;  %s1155_s21 = smov [#allocation3]  }
  0x1e   : > { %929 = vmatpush3.bf16.msra.mxu1 %v1059_v13  ;;  %312 = vst.msk [vmem:[#allocation2 + $0x10] sm:$0xff] %vm305_vm1, %v892_v18  ;;  %s1077_s25 = sshll.u32 %s1155_s21, 4  ;;  %s1078_s25 = int_to_ptr.vmem [resolvable:$false] %s1077_s25 }
  0x1f   : > { %930 = vmatprep.subr.bf16.mxu1 %v1153_v1  ;;  %p1075_p13 = pnand %p1074_p12, %p1226_p4  ;;  %s1079_s27 = scalar_lea.vmem %s1078_s25, 256 }
  0x20   : > { %951 = vmatpush3.bf16.msra.mxu0 %v1049_v10  ;;  %p1080_p1 = scmp.lt.s32.totalorder %s1373_s12, %s1078_s25  ;;  %p1081_p2 = scmp.lt.s32.totalorder %s1079_s27, %s1073_s24 }
  0x21   : > { %952 = vmatprep.subr.bf16.mxu0 %v1153_v1  ;;  %p1076_p0 = pneg %p1075_p13 }
  0x22   : > { %931 = vmatpush3.bf16.msra.mxu1 %v1061_v15  ;;  %p1082_p3 = por %p1081_p2, %p1080_p1 }
  0x23   : > { %932 = vmatprep.subr.bf16.mxu1 %v1153_v1 }
  0x24   : > { %953 = vmatpush3.bf16.msra.mxu0 %v1050_v12  ;;  %v314_v19 = vld [vmem:[#allocation2] sm:$0xff]  ;;  %v315_v20 = vld [vmem:[#allocation2 + $0x8] sm:$0xff]  ;;  %p1083_p5 = pnand %p1082_p3, %p1076_p0 }
  0x25   : > { %954 = vmatprep.subr.bf16.mxu0 %v1153_v1  ;;  %v316_v22 = vpack.c.bf16 %v315_v20, %v314_v19  ;;  %v333_v27 = vld [vmem:[#allocation2 + $0x1] sm:$0xff]  ;;  %v334_v28 = vld [vmem:[#allocation2 + $0x9] sm:$0xff] }
  0x26   : > { %933 = vmatpush3.bf16.msra.mxu1 %v1063_v21  ;;  %v335_v29 = vpack.c.bf16 %v334_v28, %v333_v27  ;;  %v531_v36 = vld [vmem:[#allocation2 + $0x2] sm:$0xff]  ;;  %v532_v37 = vld [vmem:[#allocation2 + $0xa] sm:$0xff] }
  0x27   : > { %934 = vmatprep.subr.bf16.mxu1 %v1153_v1  ;;  %v533_v38 = vpack.c.bf16 %v532_v37, %v531_v36 }
  0x28   : > { %955 = vmatpush3.bf16.msra.mxu0 %v1051_v14 }
  0x29   : > { %956 = vmatprep.subr.bf16.mxu0 %v1153_v1 }
  0x2a   : > { %935 = vmatpush3.bf16.msra.mxu1 %v1065_v24 }
  0x2b   : > { %936 = vmatprep.subr.bf16.mxu1 %v1153_v1 }
  0x2c   : > { %957 = vmatpush3.bf16.msra.mxu0 %v1052_v17 }
  0x2d   : > { %962 = vmatprep.subr.bf16.mxu0 %v1153_v1 }
  0x2e   : > { %937 = vmatpush3.bf16.msra.mxu1 %v1067_v26 }
  0x2f   : > { %959 = vmatmul.mubr.bf16.vlgmr.msra.gmra.mrb[0].mxu0 %v316_v22 }
  0x30   : > { %963 = vmatpush3.bf16.msra.mxu0 %v1054_v23  ;;  %978 = vmatprep.mubr.msk.bf16.mxu0 %vm1154_vm0, %v1153_v1 }
  0x31   : > { %964 = vmatprep.subr.bf16.mxu0 %v1153_v1  ;;  %939 = vmatmul.mubr.bf16.vlgmr.msra.gmra.mrb[0].mxu1 %v335_v29 }
  0x34   : > { %965 = vmatpush3.bf16.msra.mxu0 %v1056_v25 }
  0x35   : > { %966 = vmatprep.subr.bf16.mxu0 %v1153_v1 }
  0x38   : > { %967 = vmatpush3.bf16.msra.mxu0 %v1058_v30 }
  0x39   : > { %968 = vmatprep.subr.bf16.mxu0 %v1153_v1 }
  0x3c   : > { %969 = vmatpush3.bf16.msra.mxu0 %v1060_v31 }
  0x3d   : > { %970 = vmatprep.subr.bf16.mxu0 %v1153_v1 }
  0x40   : > { %971 = vmatpush3.bf16.msra.mxu0 %v1062_v32 }
  0x41   : > { %972 = vmatprep.subr.bf16.mxu0 %v1153_v1 }
  0x44   : > { %973 = vmatpush3.bf16.msra.mxu0 %v1064_v33 }
  0x45   : > { %974 = vmatprep.subr.bf16.mxu0 %v1153_v1 }
  0x48   : > { %975 = vmatpush3.bf16.msra.mxu0 %v1066_v34 }
  0x49   : > { %976 = vmatprep.subr.bf16.mxu0 %v1153_v1 }
  0x4c   : > { %977 = vmatpush3.bf16.msra.mxu0 %v1068_v35 }
  0x4f   : > { %979 = vmatmul.mubr.bf16.vlgmr.msra.gmra.mrb[0].mxu0 %v533_v38 }
 0x104   : > { %v435_v39 = vpop.f32.mrb[0].mxu1 }
 0x105   : > { %v940_v40 = vpop.f32.mrb[1].mxu1 }
 0x106   : > { %v438_v41 = vpop.f32.mrb[2].mxu1 }
 0x107   : > { %v941_v42 = vpop.f32.mrb[3].mxu1 }
 0x122   : > { %v633_v43 = vpop.f32.mrb[0].mxu0 }
 0x123   : > { %v982_v45 = vadd.f32 %v633_v43, %v435_v39  ;;  %v980_v46 = vpop.f32.mrb[1].mxu0 }
 0x124   : > { %v636_v47 = vpop.f32.mrb[2].mxu0 }
 0x125   : > { %v649_v49 = vmul.f32 %v982_v45, %v877_v44  ;;  %v983_v50 = vadd.f32 %v636_v47, %v438_v41  ;;  %v981_v51 = vpop.f32.mrb[3].mxu0 }
 0x127   : > { %v650_v52 = vmul.f32 %v983_v50, %v877_v44  ;;  %v658_v53 = vadd.f32 %v878_v48, %v649_v49 }
 0x129   : > { %v659_v54 = vadd.f32 %v878_v48, %v650_v52  ;;  %v662_v55 = vmul.f32 0.70710677, %v658_v53  ;;  %v660_v58 = vmul.f32 0.5, %v658_v53 }
 0x12b   : > { %v663_v56 = vmul.f32 0.70710677, %v659_v54  ;;  %1069 = verf.f32 %v662_v55  ;;  %v661_v63 = vmul.f32 0.5, %v659_v54 }
 0x12d   : > { %1071 = verf.f32 %v663_v56 }
 0x135   : > { %v1070_v57 = vpop.eup %1069 }
 0x136   : > { %v666_v59 = vadd.f32 1.0, %v1070_v57 }
 0x137   : > { %v1072_v60 = vpop.eup %1071 }
 0x138   : > { %v668_v61 = vmul.f32 %v666_v59, %v660_v58  ;;  %v667_v62 = vadd.f32 1.0, %v1072_v60 }
 0x13a   : > { %670 = vxpose.xlu0.b32.start [1/2] (short) (narrow) %v668_v61, 8  ;;  %v669_v0 = vmul.f32 %v667_v62, %v661_v63 }
 0x13e   : > { %671 = vxpose.xlu0.b32.end [2/2] (short) (narrow) %v669_v0, 8 }
 0x1ba   : > { %v686_v1 = vpop.trf.xlu0 }
 0x1bb   : > { %703 = vst.msk [vmem:[%s273_s11] sm:$0xff] %vm702_vm2, %v686_v1 }
 0x1bc   : > { %1086 = shalt.err (!%p1083_p5)
}
 0x1bd   : > { %s1087_s29 = scalar_lea.hbm %s1371_s16, 128  ;;  %s1091_s9 = scalar_lea.hbm %s1423_s5, 256 }
 0x1be   : > { %p1088_p6 = scmp.ne.s32.totalorder %s1371_s16, %s1087_s29  ;;  %p1092_p10 = scmp.lt.u32.totalorder %s1371_s16, %s1423_s5 }
 0x1bf   : > { %p1093_p11 = scmp.lt.u32.totalorder %s1091_s9, %s1087_s29  ;;  %p1095_p13 = scmp.lt.u32.totalorder %s1087_s29, %s1371_s16 }
 0x1c0   : > { %p1089_p7 = pnand %p1088_p6, %p1226_p4 }
 0x1c1   : > { %p1094_p12 = por %p1093_p11, %p1092_p10 }
 0x1c2   : > { %p1090_p9 = pneg %p1089_p7 }
 0x1c3   : > { %p1096_p0 = por %p1095_p13, %p1094_p12 }
 0x1c5   : > { %p1097_p1 = pnand %p1096_p0, %p1090_p9 }
 0x1c7   : > { %1100 = shalt.err (!%p1097_p1)
}
 0x1c8   : > { %988 = dma.vmem_to_hbm [thread:$0]  (%p1226_p4), %s1373_s12, 128, %s1371_s16, %s705_s17  }
 0x1c9 PF: > { %p994_p2 = scmp.ge.s32.totalorder %s1151_s23, 2  ;;  %s731_s11 = sand.u32 1, %s1131_s18  }
 0x1ca   : > { %s732_s13 = scalar_lea.sflag [#allocation4], %s731_s11 }
 0x1cb   : > { %p991_p3 = pnand %p994_p2, %p1233_p8 }
 0x1cd   : > { %1126 = dma.done.wait (!%p991_p3), %s732_s13, 128  }
 0x1ce   : > { %1128 = vsyncadd (!%p991_p3), %s732_s13, 4294967168  ;;  %s18_s23 = sadd.s32 1, %s1151_s23   ;;  %s1426_s18 = smov %s1135_s19 }
 0x1cf   : > { %p15_p5 = scmp.ge.s32.totalorder %s18_s23, 4   ;;  %s1427_s19 = smov %s1139_s20 }
 0x1d0   : > { %s1428_s20 = smov %s1239_s6  ;;  %s1429_s21 = smov %s1147_s22 }
 0x1d1   : > { %s1430_s22 = smov %s1432_s26  ;;  %17 = sbr.rel (!%p15_p5) target bundleno = 4 (0x4), region = 80 }
 0x1d8   :  { %737 = vsyncpa [#allocation4], 1 }
 0x1d9   :  { %739 = vsyncpa [#allocation4 + $0x1], 1 }

// kernel: cbr_forward.2
= control target key start
LH: loop header
LB: loop body
LE: loop exit
PB: predicated region body
PF: predicated region fallthrough
CT: control target
= control target key end

     0   :  { %s1054_s15 = smov 0   ;;  %s1056_s16 = smov 0   ;;  %s1206_s0 = inlined_call_operand.vmem [shape: bf16[2,32,4], index: 0, kind: input, shape index: {}, may-alias: {0,1}]   ;;  %s1207_s1 = inlined_call_operand.vmem [shape: bf16[2,32,4], index: 1, kind: input, shape index: {}, may-alias: {0,1}]   ;;  %s1208_s2 = inlined_call_operand.vmem [shape: bf16[3,128,128], index: 2, kind: input, shape index: {}]   ;;  %s1209_s3 = inlined_call_operand.vmem [shape: f32[2,1,1,128], index: 3, kind: output, shape index: {0}]   ;;  %s1210_s4 = inlined_call_operand.vmem [shape: f32[2,1,1,128], index: 4, kind: output, shape index: {1}]  }
   0x1   :  { %s1058_s17 = smov 0  }
   0x2 LB: > { %s27_s18 = sadd.s32 1, %s1021_s16  ;;  %p785_p0 = scmp.ge.s32.totalorder %s1025_s17, 1  ;;  %s1025_s17 = sphi %s1058_s17, %s15_s17   ;;  %s1021_s16 = sphi %s1056_s16, %s1212_s16   ;;  %s1017_s15 = sphi %s1054_s15, %s1211_s15  }
   0x3   : > { %p29_p1 = scmp.ge.s32.totalorder %s27_s18, 2  ;;  %p209_p2 = scmp.lt.s32.totalorder %s1025_s17, 3 }
   0x5   : > { %s1214_s18 = smov (%p29_p1, %s27_s18), 0  ;;  %p210_p3 = pnand %p785_p0, %p209_p2 }
   0x6   : > { %v979_v0 = vld [vmem:[%s1208_s2] sm:$0xff] (!%p210_p3)   ;;  %v1027_v1 = vmov (!%p210_p3), 0.0   ;;  %v980_v2 = vld [vmem:[%s1208_s2 + $0x8] sm:$0xff] (!%p210_p3)   ;;  %vm1028_vm0 = vmmov (!%p210_p3), 0   ;;  %p257_p4 = scmp.lt.s32.totalorder (!%p210_p3), %s1017_s15, 1  ;;  %v981_v3 = vld [vmem:[%s1208_s2 + $0x10] sm:$0xff] (!%p210_p3)  }
   0x7   : > { %213 = sbr.rel (%p210_p3) target bundleno = 322 (0x142), region = 32  ;;  %907 = vmatprep.subr.bf16.mxu0 (!%p210_p3), %v1027_v1  ;;  %291 = vst [vmem:[#allocation2] sm:$0xff] (!%p210_p3), %v1027_v1  ;;  %292 = vst [vmem:[#allocation2 + $0x8] sm:$0xff] (!%p210_p3), %v1027_v1  ;;  %887 = vmatprep.subr.bf16.mxu1 (!%p210_p3), %v1027_v1  ;;  %v987_v4 = vld [vmem:[%s1208_s2 + $0x40] sm:$0xff] (!%p210_p3)   ;;  %vm299_vm1 = vcmask (!%p210_p3), 31744   ;;  %v982_v6 = vld [vmem:[%s1208_s2 + $0x18] sm:$0xff] (!%p210_p3)  }
   0x8   : > { %293 = vst [vmem:[#allocation2 + $0x10] sm:$0xff] (!%p210_p3), %v1027_v1  ;;  %908 = vmatpush3.bf16.msra.mxu0 (!%p210_p3), %v979_v0  ;;  %923 = vmatprep.mubr.msk.bf16.mxu0 (!%p210_p3), %vm1028_vm0, %v1027_v1  ;;  %v989_v9 = vld [vmem:[%s1208_s2 + $0x48] sm:$0xff] (!%p210_p3)   ;;  %v983_v10 = vld [vmem:[%s1208_s2 + $0x20] sm:$0xff] (!%p210_p3)   ;;  %v991_v11 = vld [vmem:[%s1208_s2 + $0x50] sm:$0xff] (!%p210_p3)  }
   0x9   : > { %909 = vmatprep.subr.bf16.mxu0 (!%p210_p3), %v1027_v1  ;;  %903 = vmatprep.mubr.msk.bf16.mxu1 (!%p210_p3), %vm1028_vm0, %v1027_v1  ;;  %v984_v12 = vld [vmem:[%s1208_s2 + $0x28] sm:$0xff] (!%p210_p3)   ;;  %v993_v13 = vld [vmem:[%s1208_s2 + $0x58] sm:$0xff] (!%p210_p3)   ;;  %v985_v14 = vld [vmem:[%s1208_s2 + $0x30] sm:$0xff] (!%p210_p3)  }
   0xa   : > { %888 = vmatpush3.bf16.msra.mxu1 (!%p210_p3), %v987_v4  ;;  %v995_v15 = vld [vmem:[%s1208_s2 + $0x60] sm:$0xff] (!%p210_p3)   ;;  %v986_v17 = vld [vmem:[%s1208_s2 + $0x38] sm:$0xff] (!%p210_p3)   ;;  %v997_v21 = vld [vmem:[%s1208_s2 + $0x68] sm:$0xff] (!%p210_p3)  }
   0xb   : > { %889 = vmatprep.subr.bf16.mxu1 (!%p210_p3), %v1027_v1  ;;  %v988_v23 = vld [vmem:[%s1208_s2 + $0x80] sm:$0xff] (!%p210_p3)   ;;  %v999_v24 = vld [vmem:[%s1208_s2 + $0x70] sm:$0xff] (!%p210_p3)   ;;  %v990_v25 = vld [vmem:[%s1208_s2 + $0x88] sm:$0xff] (!%p210_p3)  }
   0xc   : > { %910 = vmatpush3.bf16.msra.mxu0 (!%p210_p3), %v980_v2  ;;  %v1001_v26 = vld [vmem:[%s1208_s2 + $0x78] sm:$0xff] (!%p210_p3)   ;;  %v992_v30 = vld [vmem:[%s1208_s2 + $0x90] sm:$0xff] (!%p210_p3)   ;;  %v996_v32 = vld [vmem:[%s1208_s2 + $0xa0] sm:$0xff] (!%p210_p3)  }
   0xd   : > { %911 = vmatprep.subr.bf16.mxu0 (!%p210_p3), %v1027_v1  ;;  %v994_v31 = vld [vmem:[%s1208_s2 + $0x98] sm:$0xff] (!%p210_p3)   ;;  %v998_v33 = vld [vmem:[%s1208_s2 + $0xa8] sm:$0xff] (!%p210_p3)   ;;  %v1000_v34 = vld [vmem:[%s1208_s2 + $0xb0] sm:$0xff] (!%p210_p3)  }
   0xe   : > { %s1216_s15 = smov (!%p257_p4, %s1017_s15), 1  ;;  %890 = vmatpush3.bf16.msra.mxu1 %v989_v9  ;;  %v1002_v35 = vld [vmem:[%s1208_s2 + $0xb8] sm:$0xff]  }
   0xf   : > { %s848_s25 = sshll.u32 %s1216_s15, 4  ;;  %891 = vmatprep.subr.bf16.mxu1 %v1027_v1  ;;  %s283_s7 = scalar_lea.vmem %s1209_s3, %s1216_s15 }
  0x10   : > { %s264_s28 = scalar_lea.vmem %s1206_s0, %s848_s25  ;;  %912 = vmatpush3.bf16.msra.mxu0 %v981_v3  ;;  %s850_s21 = sadd.s32 8, %s848_s25 }
  0x11   : > { %v852_v5 = vld [vmem:[%s264_s28] sm:$0xff]   ;;  %913 = vmatprep.subr.bf16.mxu0 %v1027_v1  ;;  %s275_s27 = scalar_lea.vmem %s1207_s1, %s850_s21  ;;  %s289_s10 = scalar_lea.vmem %s1210_s4, %s1216_s15 }
  0x12   : > { %v853_v7 = vunpack.c.l.bf16 %v852_v5  ;;  %v854_v8 = vunpack.c.h.bf16 %v852_v5  ;;  %892 = vmatpush3.bf16.msra.mxu1 %v991_v11  ;;  %v856_v16 = vld [vmem:[%s275_s27] sm:$0xff]  }
  0x13   : > { %893 = vmatprep.subr.bf16.mxu1 %v1027_v1  ;;  %v857_v18 = vunpack.c.l.bf16 %v856_v16 }
  0x14   : > { %300 = vst.msk [vmem:[#allocation2] sm:$0xff] %vm299_vm1, %v853_v7  ;;  %301 = vst.msk [vmem:[#allocation2 + $0x8] sm:$0xff] %vm299_vm1, %v854_v8  ;;  %914 = vmatpush3.bf16.msra.mxu0 %v982_v6 }
  0x15   : > { %915 = vmatprep.subr.bf16.mxu0 %v1027_v1  ;;  %306 = vst.msk [vmem:[#allocation2 + $0x10] sm:$0xff] %vm299_vm1, %v857_v18 }
  0x16   : > { %894 = vmatpush3.bf16.msra.mxu1 %v993_v13 }
  0x17   : > { %895 = vmatprep.subr.bf16.mxu1 %v1027_v1 }
  0x18   : > { %916 = vmatpush3.bf16.msra.mxu0 %v983_v10 }
  0x19   : > { %917 = vmatprep.subr.bf16.mxu0 %v1027_v1 }
  0x1a   : > { %896 = vmatpush3.bf16.msra.mxu1 %v995_v15 }
  0x1b   : > { %v308_v19 = vld [vmem:[#allocation2] sm:$0xff]  ;;  %v309_v20 = vld [vmem:[#allocation2 + $0x8] sm:$0xff]  ;;  %897 = vmatprep.subr.bf16.mxu1 %v1027_v1 }
  0x1c   : > { %918 = vmatpush3.bf16.msra.mxu0 %v984_v12  ;;  %v310_v22 = vpack.c.bf16 %v309_v20, %v308_v19  ;;  %v327_v27 = vld [vmem:[#allocation2 + $0x1] sm:$0xff]  ;;  %v328_v28 = vld [vmem:[#allocation2 + $0x9] sm:$0xff] }
  0x1d   : > { %919 = vmatprep.subr.bf16.mxu0 %v1027_v1  ;;  %v329_v29 = vpack.c.bf16 %v328_v28, %v327_v27  ;;  %v525_v36 = vld [vmem:[#allocation2 + $0x2] sm:$0xff]  ;;  %v526_v37 = vld [vmem:[#allocation2 + $0xa] sm:$0xff] }
  0x1e   : > { %898 = vmatpush3.bf16.msra.mxu1 %v997_v21  ;;  %v527_v38 = vpack.c.bf16 %v526_v37, %v525_v36 }
  0x1f   : > { %899 = vmatprep.subr.bf16.mxu1 %v1027_v1 }
  0x20   : > { %920 = vmatpush3.bf16.msra.mxu0 %v985_v14 }
  0x21   : > { %921 = vmatprep.subr.bf16.mxu0 %v1027_v1 }
  0x22   : > { %900 = vmatpush3.bf16.msra.mxu1 %v999_v24 }
  0x23   : > { %901 = vmatprep.subr.bf16.mxu1 %v1027_v1 }
  0x24   : > { %922 = vmatpush3.bf16.msra.mxu0 %v986_v17 }
  0x25   : > { %927 = vmatprep.subr.bf16.mxu0 %v1027_v1 }
  0x26   : > { %902 = vmatpush3.bf16.msra.mxu1 %v1001_v26 }
  0x27   : > { %924 = vmatmul.mubr.bf16.vlgmr.msra.gmra.mrb[0].mxu0 %v310_v22 }
  0x28   : > { %928 = vmatpush3.bf16.msra.mxu0 %v988_v23  ;;  %943 = vmatprep.mubr.msk.bf16.mxu0 %vm1028_vm0, %v1027_v1 }
  0x29   : > { %929 = vmatprep.subr.bf16.mxu0 %v1027_v1  ;;  %904 = vmatmul.mubr.bf16.vlgmr.msra.gmra.mrb[0].mxu1 %v329_v29 }
  0x2c   : > { %930 = vmatpush3.bf16.msra.mxu0 %v990_v25 }
  0x2d   : > { %931 = vmatprep.subr.bf16.mxu0 %v1027_v1 }
  0x30   : > { %932 = vmatpush3.bf16.msra.mxu0 %v992_v30 }
  0x31   : > { %933 = vmatprep.subr.bf16.mxu0 %v1027_v1 }
  0x34   : > { %934 = vmatpush3.bf16.msra.mxu0 %v994_v31 }
  0x35   : > { %935 = vmatprep.subr.bf16.mxu0 %v1027_v1 }
  0x38   : > { %936 = vmatpush3.bf16.msra.mxu0 %v996_v32 }
  0x39   : > { %937 = vmatprep.subr.bf16.mxu0 %v1027_v1 }
  0x3c   : > { %938 = vmatpush3.bf16.msra.mxu0 %v998_v33 }
  0x3d   : > { %939 = vmatprep.subr.bf16.mxu0 %v1027_v1 }
  0x40   : > { %940 = vmatpush3.bf16.msra.mxu0 %v1000_v34 }
  0x41   : > { %941 = vmatprep.subr.bf16.mxu0 %v1027_v1 }
  0x44   : > { %942 = vmatpush3.bf16.msra.mxu0 %v1002_v35 }
  0x47   : > { %944 = vmatmul.mubr.bf16.vlgmr.msra.gmra.mrb[0].mxu0 %v527_v38 }
  0xfc   : > { %v429_v39 = vpop.f32.mrb[0].mxu1 }
  0xfd   : > { %v905_v40 = vpop.f32.mrb[1].mxu1 }
  0xfe   : > { %v432_v41 = vpop.f32.mrb[2].mxu1 }
  0xff   : > { %v906_v42 = vpop.f32.mrb[3].mxu1 }
 0x11a   : > { %v627_v43 = vpop.f32.mrb[0].mxu0 }
 0x11b   : > { %v947_v44 = vadd.f32 %v627_v43, %v429_v39  ;;  %v945_v45 = vpop.f32.mrb[1].mxu0 }
 0x11c   : > { %v630_v46 = vpop.f32.mrb[2].mxu0 }
 0x11d   : > { %v948_v47 = vadd.f32 %v630_v46, %v432_v41  ;;  %v946_v48 = vpop.f32.mrb[3].mxu0 }
 0x11f   : > { %v636_v49 = vadd.f32 %v948_v47, %v947_v44 }
 0x121   : > { %v637_v50 = vrot.slane %v636_v49, 4 }
 0x123   : > { %v638_v51 = vadd.f32 %v637_v50, %v636_v49 }
 0x125   : > { %v639_v52 = vrot.slane %v638_v51, 2 }
 0x127   : > { %v640_v53 = vadd.f32 %v639_v52, %v638_v51 }
 0x129   : > { %v641_v54 = vrot.slane %v640_v53, 1 }
 0x12b   : > { %v642_v55 = vadd.f32 %v641_v54, %v640_v53 }
 0x12d   : > { %v643_v56 = vmul.f32 0.0625, %v642_v55  ;;  %655 = vst [vmem:[%s283_s7] sm:$0x1] %v642_v55 }
 0x12f   : > { %v644_v57 = vsub.f32 %v947_v44, %v643_v56  ;;  %v645_v58 = vsub.f32 %v948_v47, %v643_v56 }
 0x131   : > { %v646_v59 = vmul.f32 %v644_v57, %v644_v57  ;;  %v647_v60 = vmul.f32 %v645_v58, %v645_v58 }
 0x133   : > { %v648_v61 = vadd.f32 %v647_v60, %v646_v59 }
 0x135   : > { %v649_v62 = vrot.slane %v648_v61, 4 }
 0x137   : > { %v650_v63 = vadd.f32 %v649_v62, %v648_v61 }
 0x139   : > { %v651_v0 = vrot.slane %v650_v63, 2 }
 0x13b   : > { %v652_v1 = vadd.f32 %v651_v0, %v650_v63 }
 0x13d   : > { %v653_v2 = vrot.slane %v652_v1, 1 }
 0x13f   : > { %v654_v3 = vadd.f32 %v653_v2, %v652_v1 }
 0x141   : > { %656 = vst [vmem:[%s289_s10] sm:$0x1] %v654_v3 }
 0x142 PF: > { %s15_s17 = sadd.s32 1, %s1025_s17   ;;  %s1211_s15 = smov %s1021_s16 }
 0x143   : > { %p12_p5 = scmp.ge.s32.totalorder %s15_s17, 4   ;;  %s1212_s16 = smov %s1214_s18 }
 0x145   :  { %14 = sbr.rel (!%p12_p5) target bundleno = 2 (0x2), region = 79 }

</bundles_post_ra>
